<compile_context>
chip_gen: v7x
topology: tpu7x:2x2x1
jax: 0.10.0
libtpu: 0.0.40
codegen_flags: <defaults>
</compile_context>

<pallas_src>
from functools import partial

import jax
import jax.numpy as jnp
from jax.experimental import pallas as pl
from jax.experimental.pallas import tpu as pltpu


# -----------------------------------------------------------------------------
# Kernels
# -----------------------------------------------------------------------------
def _mlp_lane_dense_kernel(xt_ref, w1_ref, b1_ref, w2_ref, b2_ref, ot_ref):
    """Lane-dense tile: batch sits on the 128-wide lane axis.

    xt_ref: (3, TB)   input tile (features x batch)
    w1_ref: (20, 3)   fc1.weight (PyTorch [out, in] layout)
    b1_ref: (20, 1)
    w2_ref: (3, 20)   fc2.weight
    b2_ref: (3, 1)
    ot_ref: (3, TB)   output tile (features x batch)
    """
    xt = xt_ref[...]
    # fc1: (20, 3) @ (3, TB) -> (20, TB).  K=3 underuses the MXU, but this
    # kernel is HBM-bound, so the dot stays off the critical path.
    h = jnp.dot(w1_ref[...], xt, preferred_element_type=jnp.float32)
    h = jnp.tanh(h + b1_ref[...])                       # tanh -> EUP, lane-dense
    # fc2: (3, 20) @ (20, TB) -> (3, TB)
    yt = jnp.dot(w2_ref[...], h, preferred_element_type=jnp.float32)
    ot_ref[...] = (yt + b2_ref[...]).astype(ot_ref.dtype)   # lane-dense store


def _mlp_small_kernel(x_ref, w1t_ref, b1_ref, w2t_ref, b2_ref, o_ref):
    """Single-block path for tiny batches: the whole problem is a few vregs.

    x_ref: (B, 3), w1t_ref: (3, 20), b1_ref: (1, 20),
    w2t_ref: (20, 3), b2_ref: (1, 3), o_ref: (B, 3).
    """
    x = x_ref[...]
    h = jnp.tanh(
        jnp.dot(x, w1t_ref[...], preferred_element_type=jnp.float32) + b1_ref[...]
    )
    y = jnp.dot(h, w2t_ref[...], preferred_element_type=jnp.float32) + b2_ref[...]
    o_ref[...] = y.astype(o_ref.dtype)


# -----------------------------------------------------------------------------
# Wrappers
# -----------------------------------------------------------------------------
def _round_up(x, m):
    return ((x + m - 1) // m) * m


@partial(jax.jit, static_argnames=("block_b",))
def mynet_forward_t(xt, w1, b1, w2, b2, block_b=32768):
    """High-throughput entry point in the transposed (features, batch) layout.

    xt: (3, B) float32  ->  yt: (3, B) float32.

    Callers that keep activations in this layout pay exactly 1x HBM traffic:
    every load / VPU op / tanh / store in the kernel is lane-dense, and the
    batch-tiled grid is double-buffered by the BlockSpec pipeline.
    """
    d_in, B = xt.shape
    d_hid, d_out = w1.shape[0], w2.shape[0]

    # Lane tile: multiple of 128, no larger than the (rounded-up) batch.
    block_b = max(128, min(_round_up(block_b, 128), _round_up(B, 128)))
    n_blocks = pl.cdiv(B, block_b)
    b_pad = n_blocks * block_b
    if b_pad != B:                      # ragged tail only; no-op when B divides
        xt = jnp.pad(xt, ((0, 0), (0, b_pad - B)))

    yt = pl.pallas_call(
        _mlp_lane_dense_kernel,
        out_shape=jax.ShapeDtypeStruct((d_out, b_pad), xt.dtype),
        grid=(n_blocks,),
        in_specs=[
            # Batch-tiled, double-buffered input (lane axis = batch).
            pl.BlockSpec((d_in, block_b), lambda i: (0, i)),
            # Weights / biases: constant index_map -> resident in VMEM, no re-DMA.
            pl.BlockSpec((d_hid, d_in), lambda i: (0, 0)),
            pl.BlockSpec((d_hid, 1), lambda i: (0, 0)),
            pl.BlockSpec((d_out, d_hid), lambda i: (0, 0)),
            pl.BlockSpec((d_out, 1), lambda i: (0, 0)),
        ],
        out_specs=pl.BlockSpec((d_out, block_b), lambda i: (0, i)),
        compiler_params=pltpu.CompilerParams(
            # Independent batch tiles: shard across v7x's two TensorCores.
            dimension_semantics=("parallel",),
            # block_b up to 65536 stays under this cap (fits v7x's 64 MiB VMEM
            # with double-buffered (3, block_b) tiles + the (20, block_b) temp).
            vmem_limit_bytes=32 * 1024 * 1024,
        ),
    )(xt, w1, b1.reshape(d_hid, 1), w2, b2.reshape(d_out, 1))

    return yt if b_pad == B else yt[:, :B]


@partial(jax.jit, static_argnames=("block_b", "small_batch_max"))
def mynet_forward(x, w1, b1, w2, b2, block_b=32768, small_batch_max=1024):
    """PyTorch-layout MyNet.forward: x (B, 3) -> y (B, 3)."""
    B, _ = x.shape
    d_out = w2.shape[0]

    if B <= small_batch_max:
        # Tiny batch (the module's actual B=10 case): one block, whole problem
        # resident in VMEM, no padding / activation transposes / grid.  The
        # weight transposes are a few hundred bytes and fold into the call.
        return pl.pallas_call(
            _mlp_small_kernel,
            out_shape=jax.ShapeDtypeStruct((B, d_out), x.dtype),
        )(x, w1.T, b1.reshape(1, -1), w2.T, b2.reshape(1, -1))

    # Large batch: run the lane-dense kernel.  The two activation transposes
    # below are the price of the PyTorch (batch, features) interface; callers
    # that can hold (features, batch) should use mynet_forward_t directly and
    # skip them entirely (review item 1).
    yt = mynet_forward_t(x.T, w1, b1, w2, b2, block_b=block_b)
    return yt.T


def reference_forward(x, w1, b1, w2, b2):
    h1 = jnp.tanh(x @ w1.T + b1)
    return h1 @ w2.T + b2


if __name__ == "__main__":
    key = jax.random.PRNGKey(0)
    kx, k1w, k1b, k2w, k2b, kx2 = jax.random.split(key, 6)

    # Shapes from the PyTorch script: x = torch.zeros(10, 3); Linear(3,20)->Linear(20,3).
    B, D_IN, D_HID, D_OUT = 10, 3, 20, 3
    x = jax.random.normal(kx, (B, D_IN), dtype=jnp.float32)

    # Deterministic init mimicking nn.Linear default U[-1/sqrt(fan_in), 1/sqrt(fan_in)].
    bound1 = 1.0 / jnp.sqrt(D_IN)
    bound2 = 1.0 / jnp.sqrt(D_HID)
    w1 = jax.random.uniform(k1w, (D_HID, D_IN), jnp.float32, -bound1, bound1)
    b1 = jax.random.uniform(k1b, (D_HID,), jnp.float32, -bound1, bound1)
    w2 = jax.random.uniform(k2w, (D_OUT, D_HID), jnp.float32, -bound2, bound2)
    b2 = jax.random.uniform(k2b, (D_OUT,), jnp.float32, -bound2, bound2)

    # 1) The module's actual workload (B=10) -> single-block small-batch path.
    out = jax.block_until_ready(mynet_forward(x, w1, b1, w2, b2))
    ref = reference_forward(x, w1, b1, w2, b2)
    assert out.shape == (B, D_OUT)
    assert jnp.allclose(out, ref, atol=1e-5, rtol=1e-5), "small-batch mismatch"

    # 2) Larger batch -> lane-dense tiled path (4 grid blocks at block_b=512),
    #    exercising the pipelined grid + "parallel" batch axis.
    B2 = 2048
    x2 = jax.random.normal(kx2, (B2, D_IN), dtype=jnp.float32)
    ref2 = reference_forward(x2, w1, b1, w2, b2)

    out2 = jax.block_until_ready(mynet_forward(x2, w1, b1, w2, b2, block_b=512))
    assert out2.shape == (B2, D_OUT)
    assert jnp.allclose(out2, ref2, atol=1e-5, rtol=1e-5), "tiled-path mismatch"

    # 3) Native transposed entry point (caller keeps (features, batch) layout ->
    #    zero relayout ops, 1x HBM traffic).
    out3 = jax.block_until_ready(mynet_forward_t(x2.T, w1, b1, w2, b2, block_b=512))
    assert out3.shape == (D_OUT, B2)
    assert jnp.allclose(out3, ref2.T, atol=1e-5, rtol=1e-5), "transposed-path mismatch"

    print("KERNEL_OK")
</pallas_src>

<mosaic_0001>
module attributes {stable_mosaic.version = 11 : i64} {
  func.func @_mlp_small_kernel(%arg0: memref<10x3xf32, #tpu.memory_space<vmem>>, %arg1: memref<3x20xf32, #tpu.memory_space<vmem>>, %arg2: memref<1x20xf32, #tpu.memory_space<vmem>>, %arg3: memref<20x3xf32, #tpu.memory_space<vmem>>, %arg4: memref<1x3xf32, #tpu.memory_space<vmem>>, %arg5: memref<10x3xf32, #tpu.memory_space<vmem>>) attributes {dimension_semantics = [], scalar_prefetch = 0 : i64, scratch_operands = 0 : i64, tpu.core_type = #tpu.core_type<tc>} {
    %c0 = arith.constant 0 : index
    %c0_0 = arith.constant 0 : index
    %0 = vector.load %arg0[%c0, %c0_0] : memref<10x3xf32, #tpu.memory_space<vmem>>, vector<10x3xf32>
    %c0_1 = arith.constant 0 : index
    %c0_2 = arith.constant 0 : index
    %1 = vector.load %arg1[%c0_1, %c0_2] : memref<3x20xf32, #tpu.memory_space<vmem>>, vector<3x20xf32>
    %cst = arith.constant dense<0.000000e+00> : vector<10x20xf32>
    %2 = tpu.matmul %0, %1, %cst {dimension_numbers = #tpu.dot_dimension_numbers<[1], [0], [0], [1], [0, 0, 1, 1], [], []>} : vector<10x3xf32>, vector<3x20xf32>, vector<10x20xf32> -> vector<10x20xf32>
    %c0_3 = arith.constant 0 : index
    %c0_4 = arith.constant 0 : index
    %3 = vector.load %arg2[%c0_3, %c0_4] : memref<1x20xf32, #tpu.memory_space<vmem>>, vector<1x20xf32>
    %4 = vector.broadcast %3 : vector<1x20xf32> to vector<10x20xf32>
    %5 = arith.addf %2, %4 : vector<10x20xf32>
    %6 = math.tanh %5 : vector<10x20xf32>
    %c0_5 = arith.constant 0 : index
    %c0_6 = arith.constant 0 : index
    %7 = vector.load %arg3[%c0_5, %c0_6] : memref<20x3xf32, #tpu.memory_space<vmem>>, vector<20x3xf32>
    %cst_7 = arith.constant dense<0.000000e+00> : vector<10x3xf32>
    %8 = tpu.matmul %6, %7, %cst_7 {dimension_numbers = #tpu.dot_dimension_numbers<[1], [0], [0], [1], [0, 0, 1, 1], [], []>} : vector<10x20xf32>, vector<20x3xf32>, vector<10x3xf32> -> vector<10x3xf32>
    %c0_8 = arith.constant 0 : index
    %c0_9 = arith.constant 0 : index
    %9 = vector.load %arg4[%c0_8, %c0_9] : memref<1x3xf32, #tpu.memory_space<vmem>>, vector<1x3xf32>
    %10 = vector.broadcast %9 : vector<1x3xf32> to vector<10x3xf32>
    %11 = arith.addf %8, %10 : vector<10x3xf32>
    %c0_10 = arith.constant 0 : index
    %c0_11 = arith.constant 0 : index
    %12 = vector.load %arg5[%c0_10, %c0_11] : memref<10x3xf32, #tpu.memory_space<vmem>>, vector<10x3xf32>
    tpu.vector_store %arg5[%c0_10, %c0_11], %11 {strides = array<i32>} : memref<10x3xf32, #tpu.memory_space<vmem>>, vector<10x3xf32>,
    return
  }
}

</mosaic_0001>

<bundles_post_ra>
// kernel: mynet_forward.1
= control target key start
LH: loop header
LB: loop body
LE: loop exit
PB: predicated region body
PF: predicated region fallthrough
CT: control target
= control target key end

     0   :  { %vm37_vm0 = vcmask 1042432   ;;  %vm30_vm1 = vcmask 23552   ;;  %vm135_vm2 = vcmask 1043456   ;;  %vm128_vm3 = vcmask 162816   ;;  %s322_s1 = inlined_call_operand.vmem [shape: f32[3,20], index: 1, kind: input, shape index: {}]   ;;  %s323_s0 = inlined_call_operand.vmem [shape: f32[10,3], index: 0, kind: input, shape index: {}]   ;;  %s324_s3 = inlined_call_operand.vmem [shape: f32[20,3], index: 3, kind: input, shape index: {}]   ;;  %s325_s2 = inlined_call_operand.vmem [shape: f32[1,20], index: 2, kind: input, shape index: {}]   ;;  %s326_s4 = inlined_call_operand.vmem [shape: f32[1,3], index: 4, kind: input, shape index: {}]   ;;  %s327_s5 = inlined_call_operand.vmem [shape: f32[10,3], index: 5, kind: output, shape index: {}]  }
   0x1   :  { %v22_v0 = vld [vmem:[%s322_s1] sm:$0x7]  ;;  %v21_v2 = vld [vmem:[%s323_s0 + $0x8] sm:$0x3]  ;;  %v120_v6 = vld [vmem:[%s324_s3 + $0x10] sm:$0xf] }
   0x2   :  { %v20_v1 = vld [vmem:[%s323_s0] sm:$0xff]  ;;  %237 = vmatprep.subr.msk.mxu0 %vm37_vm0, %v22_v0  ;;  %v119_v4 = vld [vmem:[%s324_s3 + $0x8] sm:$0xff]  ;;  %vm215_vm4 = vcmask 17408  }
   0x3   :  { %239 = vmatprep.mubr.msk.f32.mxu0 %vm30_vm1, %v20_v1  ;;  %238 = vmatpush3.msk.msra.mxu0 %vm37_vm0, %v22_v0  ;;  %v118_v3 = vld [vmem:[%s324_s3] sm:$0xff] }
   0x4   :  { %240 = vmatmul.mubr.msk.f32.vlgmr.msra.gmra.mrb[0].mxu0 %vm30_vm1, %v21_v2  ;;  %v251_v5 = vpack.c.bf16 %v119_v4, %v118_v3  ;;  %v221_v7 = vld [vmem:[%s325_s2] ss:$0 sm:$0xff] }
   0x5   :  { %v225_v14 = vld [vmem:[%s326_s4] ss:$0 sm:$0xff] }
   0x6   :  { %252 = vmatprep.subr.bf16.mxu1 %v251_v5 }
   0x7   :  { %254 = vmatpush3.bf16.msra.mxu1 %v251_v5 }
   0x8   :  { %246 = vmatprep.subr.msk.mxu1 %vm135_vm2, %v120_v6 }
   0xb   :  { %247 = vmatpush3.msk.msra.mxu1 %vm135_vm2, %v120_v6 }
  0xd7   :  { %v241_v8 = vpop.f32.mrb[0].mxu0 }
  0xd8   :  { %v113_v9 = vadd.f32 %v241_v8, %v221_v7  ;;  %v107_v10 = vpop.f32.mrb[1].mxu0 }
  0xd9   :  { %v108_v11 = vadd.f32 %v221_v7, %v107_v10 }
  0xdb   :  { %255 = vtanh.f32 %v108_v11 }
  0xdc   :  { %257 = vtanh.f32 %v113_v9 }
  0xe5   :  { %v256_v12 = vpop.eup %255 }
  0xe6   :  { %v258_v13 = vpop.eup %257  ;;  %248 = vmatprep.mubr.msk.f32.mxu1 %vm128_vm3, %v256_v12 }
  0xe7   :  { %249 = vmatmul.mubr.msk.f32.vlgmr.msra.gmra.mrb[0].mxu1 %vm128_vm3, %v258_v13 }
 0x1ba   :  { %v250_v15 = vpop.f32.mrb[0].mxu1 }
 0x1bb   :  { %v211_v16 = vadd.f32 %v250_v15, %v225_v14  ;;  %v205_v17 = vpop.f32.mrb[1].mxu1 }
 0x1bc   :  { %v206_v18 = vadd.f32 %v225_v14, %v205_v17 }
 0x1bd   :  { %216 = vst.msk [vmem:[%s327_s5 + $0x8] sm:$0x3] %vm215_vm4, %v211_v16 }
 0x1be   :  { %214 = vst.msk [vmem:[%s327_s5] sm:$0xff] %vm30_vm1, %v206_v18 }

</bundles_post_ra>
